<compile_context>
chip_gen: v5e
topology: v5e:2x2
jax: 0.10.0
libtpu: 0.0.40
codegen_flags: <defaults>
</compile_context>

<pallas_src>
import functools

import jax
import jax.numpy as jnp
from jax import lax
from jax.experimental import pallas as pl
from jax.experimental.pallas import tpu as pltpu


def _round_up(n, m):
    return ((n + m - 1) // m) * m


def _mlp_kernel(x_ref, w1_ref, b1_ref, w2t_ref, b2_ref, o_ref):
    # x_ref:   (TB, D)    w1_ref: (D, H)    b1_ref: (1, H)
    # w2t_ref: (O, H)     b2_ref: (O, 1)    o_ref:  (O, TB)   (lane-dense)
    x = x_ref[...]
    h = jnp.dot(x, w1_ref[...], preferred_element_type=jnp.float32) + b1_ref[...]
    h = jnp.maximum(h, 0.0)  # ReLU
    # Second layer in transposed form: y[o, b] = sum_h w2t[o, h] * h[b, h] + b2[o].
    # Contracting over H keeps the batch axis on the 128-lane axis of the
    # output tile (dense, unmasked stores) and avoids an N=1 matmul.
    y = lax.dot_general(
        w2t_ref[...], h,
        dimension_numbers=(((1,), (1,)), ((), ())),
        preferred_element_type=jnp.float32,
    ) + b2_ref[...]
    o_ref[...] = jax.nn.sigmoid(y).astype(o_ref.dtype)  # Sigmoid output act


@functools.partial(jax.jit, static_argnames=("tile_b",))
def one_hidden_forward(x, w1, b1, w2, b2, *, tile_b=1024):
    """x: [B, D] f32; w1: [D, H]; b1: [H]; w2: [H, O]; b2: [O] -> [B, O] f32."""
    B, D = x.shape
    H = w1.shape[1]
    O = w2.shape[1]

    # Batch tile: multiple of 128 so the (O, tile) output block is lane-dense
    # and the (tile, D) x block satisfies the (8, 128) layout constraint.
    tb = min(int(tile_b), _round_up(B, 128))
    tb = _round_up(max(tb, 128), 128)
    Bp = _round_up(B, tb)

    x_p = x if Bp == B else jnp.pad(x, ((0, Bp - B), (0, 0)))

    b1_2d = b1.reshape(1, H)
    w2_t = w2.T.reshape(O, H)   # pre-transposed so the 2nd dot contracts over H
    b2_2d = b2.reshape(O, 1)

    grid = (Bp // tb,)

    # Estimated double-buffered VMEM footprint (bytes). Only raise the scoped
    # VMEM limit when a very large tile would exceed the conservative default
    # (e.g. v5e's 16 MiB); stay <= 48 MiB so it is also legal on v7x.
    est = 4 * 2 * (tb * D + D * H + H + O * H + O + O * tb) + (1 << 20)
    cp_kwargs = dict(dimension_semantics=("parallel",))
    if est > 12 * 1024 * 1024:
        cp_kwargs["vmem_limit_bytes"] = int(min(2 * est, 48 * 1024 * 1024))

    out_t = pl.pallas_call(
        _mlp_kernel,
        out_shape=jax.ShapeDtypeStruct((O, Bp), jnp.float32),
        grid_spec=pltpu.PrefetchScalarGridSpec(
            num_scalar_prefetch=0,
            grid=grid,
            in_specs=[
                pl.BlockSpec((tb, D), lambda i: (i, 0)),   # x tile (streamed)
                pl.BlockSpec((D, H), lambda i: (0, 0)),    # W1 (resident)
                pl.BlockSpec((1, H), lambda i: (0, 0)),    # b1
                pl.BlockSpec((O, H), lambda i: (0, 0)),    # W2^T
                pl.BlockSpec((O, 1), lambda i: (0, 0)),    # b2
            ],
            out_specs=pl.BlockSpec((O, tb), lambda i: (0, i)),  # lane-dense out
        ),
        compiler_params=pltpu.CompilerParams(**cp_kwargs),
    )(x_p, w1, b1_2d, w2_t, b2_2d)

    # Drop padded rows, return batch-major (B, O) like the PyTorch module.
    return out_t[:, :B].T


def init_params(key, input_dim=512, hidden=32, num_output=1):
    """Deterministic synthetic params (PyTorch-Linear-like uniform init)."""
    k1, k2, k3, k4 = jax.random.split(key, 4)
    lim1 = 1.0 / jnp.sqrt(input_dim)
    lim2 = 1.0 / jnp.sqrt(hidden)
    # Stored as [in, out] (i.e. W.T relative to torch's [out, in]).
    w1 = jax.random.uniform(k1, (input_dim, hidden), jnp.float32, -lim1, lim1)
    b1 = jax.random.uniform(k2, (hidden,), jnp.float32, -lim1, lim1)
    w2 = jax.random.uniform(k3, (hidden, num_output), jnp.float32, -lim2, lim2)
    b2 = jax.random.uniform(k4, (num_output,), jnp.float32, -lim2, lim2)
    return w1, b1, w2, b2


if __name__ == "__main__":
    key = jax.random.PRNGKey(0)
    k_x, k_p, k_x2 = jax.random.split(key, 3)

    D, H, O = 512, 32, 1
    w1, b1, w2, b2 = init_params(k_p, input_dim=D, hidden=H, num_output=O)

    def ref_fn(xv):
        return jax.nn.sigmoid(jnp.maximum(xv @ w1 + b1, 0.0) @ w2 + b2)

    # Small demo batch (single tile; internally padded to 128 rows).
    B = 8
    x = jax.random.normal(k_x, (B, D), jnp.float32)
    out = jax.block_until_ready(one_hidden_forward(x, w1, b1, w2, b2))
    assert out.shape == (B, O)
    assert jnp.allclose(out, ref_fn(x), atol=2e-5, rtol=1e-5), "mismatch (B=8)"

    # Multi-tile + ragged-batch path (grid > 1, zero padding sliced off).
    B2 = 260
    x2 = jax.random.normal(k_x2, (B2, D), jnp.float32)
    out2 = jax.block_until_ready(
        one_hidden_forward(x2, w1, b1, w2, b2, tile_b=128))
    assert out2.shape == (B2, O)
    assert jnp.allclose(out2, ref_fn(x2), atol=2e-5, rtol=1e-5), "mismatch (B=260)"

    print("KERNEL_OK")
</pallas_src>

<mosaic_0001>
module attributes {stable_mosaic.version = 11 : i64} {
  func.func @_mlp_kernel(%arg0: i32, %arg1: memref<128x512xf32, #tpu.memory_space<vmem>>, %arg2: memref<512x32xf32, #tpu.memory_space<vmem>>, %arg3: memref<1x32xf32, #tpu.memory_space<vmem>>, %arg4: memref<1x32xf32, #tpu.memory_space<vmem>>, %arg5: memref<1x1xf32, #tpu.memory_space<vmem>>, %arg6: memref<1x128xf32, #tpu.memory_space<vmem>>) attributes {dimension_semantics = [#tpu.dimension_semantics<parallel>], iteration_bounds = array<i64: 1>, scalar_prefetch = 0 : i64, scratch_operands = 0 : i64, tpu.core_type = #tpu.core_type<tc>, window_params = [{transform_indices = @transform_0, window_bounds = array<i64: 128, 512>}, {pipeline_mode = #tpu.pipeline_mode<synchronous>, transform_indices = @transform_1, window_bounds = array<i64: 512, 32>}, {pipeline_mode = #tpu.pipeline_mode<synchronous>, transform_indices = @transform_2, window_bounds = array<i64: 1, 32>}, {pipeline_mode = #tpu.pipeline_mode<synchronous>, transform_indices = @transform_3, window_bounds = array<i64: 1, 32>}, {pipeline_mode = #tpu.pipeline_mode<synchronous>, transform_indices = @transform_4, window_bounds = array<i64: 1, 1>}, {transform_indices = @transform_5, window_bounds = array<i64: 1, 128>}]} {
    %c0 = arith.constant 0 : index
    %c0_0 = arith.constant 0 : index
    %0 = vector.load %arg1[%c0, %c0_0] : memref<128x512xf32, #tpu.memory_space<vmem>>, vector<128x512xf32>
    %c0_1 = arith.constant 0 : index
    %c0_2 = arith.constant 0 : index
    %1 = vector.load %arg2[%c0_1, %c0_2] : memref<512x32xf32, #tpu.memory_space<vmem>>, vector<512x32xf32>
    %cst = arith.constant dense<0.000000e+00> : vector<128x32xf32>
    %2 = tpu.matmul %0, %1, %cst {dimension_numbers = #tpu.dot_dimension_numbers<[1], [0], [0], [1], [0, 0, 1, 1], [], []>} : vector<128x512xf32>, vector<512x32xf32>, vector<128x32xf32> -> vector<128x32xf32>
    %c0_3 = arith.constant 0 : index
    %c0_4 = arith.constant 0 : index
    %3 = vector.load %arg3[%c0_3, %c0_4] : memref<1x32xf32, #tpu.memory_space<vmem>>, vector<1x32xf32>
    %4 = vector.broadcast %3 : vector<1x32xf32> to vector<128x32xf32>
    %5 = arith.addf %2, %4 : vector<128x32xf32>
    %cst_5 = arith.constant 0.000000e+00 : f32
    %6 = vector.broadcast %cst_5 : f32 to vector<128x32xf32>
    %7 = arith.maximumf %5, %6 : vector<128x32xf32>
    %c0_6 = arith.constant 0 : index
    %c0_7 = arith.constant 0 : index
    %8 = vector.load %arg4[%c0_6, %c0_7] : memref<1x32xf32, #tpu.memory_space<vmem>>, vector<1x32xf32>
    %cst_8 = arith.constant dense<0.000000e+00> : vector<1x128xf32>
    %9 = tpu.matmul %8, %7, %cst_8 {dimension_numbers = #tpu.dot_dimension_numbers<[1], [1], [0], [0], [0, 0, 1, 0], [], []>} : vector<1x32xf32>, vector<128x32xf32>, vector<1x128xf32> -> vector<1x128xf32>
    %c0_9 = arith.constant 0 : index
    %c0_10 = arith.constant 0 : index
    %10 = vector.load %arg5[%c0_9, %c0_10] : memref<1x1xf32, #tpu.memory_space<vmem>>, vector<1x1xf32>
    %11 = vector.broadcast %10 : vector<1x1xf32> to vector<1x128xf32>
    %12 = arith.addf %9, %11 : vector<1x128xf32>
    %13 = arith.negf %12 : vector<1x128xf32>
    %14 = math.exp %13 : vector<1x128xf32>
    %cst_11 = arith.constant 1.000000e+00 : f32
    %15 = vector.broadcast %cst_11 : f32 to vector<1x128xf32>
    %16 = arith.addf %15, %14 : vector<1x128xf32>
    %17 = arith.divf %15, %16 : vector<1x128xf32>
    %c0_12 = arith.constant 0 : index
    %c0_13 = arith.constant 0 : index
    %18 = vector.load %arg6[%c0_12, %c0_13] : memref<1x128xf32, #tpu.memory_space<vmem>>, vector<1x128xf32>
    tpu.vector_store %arg6[%c0_12, %c0_13], %17 {strides = array<i32>} : memref<1x128xf32, #tpu.memory_space<vmem>>, vector<1x128xf32>,
    return
  }
  func.func @transform_0(%arg0: i32) -> (i32, i32) {
    %c0_i32 = arith.constant 0 : i32
    %c0_i32_0 = arith.constant 0 : i32
    return %arg0, %c0_i32 : i32, i32
  }
  func.func @transform_1(%arg0: i32) -> (i32, i32) {
    %c0_i32 = arith.constant 0 : i32
    %c0_i32_0 = arith.constant 0 : i32
    %c0_i32_1 = arith.constant 0 : i32
    return %c0_i32, %c0_i32_0 : i32, i32
  }
  func.func @transform_2(%arg0: i32) -> (i32, i32) {
    %c0_i32 = arith.constant 0 : i32
    %c0_i32_0 = arith.constant 0 : i32
    %c0_i32_1 = arith.constant 0 : i32
    return %c0_i32, %c0_i32_0 : i32, i32
  }
  func.func @transform_3(%arg0: i32) -> (i32, i32) {
    %c0_i32 = arith.constant 0 : i32
    %c0_i32_0 = arith.constant 0 : i32
    %c0_i32_1 = arith.constant 0 : i32
    return %c0_i32, %c0_i32_0 : i32, i32
  }
  func.func @transform_4(%arg0: i32) -> (i32, i32) {
    %c0_i32 = arith.constant 0 : i32
    %c0_i32_0 = arith.constant 0 : i32
    %c0_i32_1 = arith.constant 0 : i32
    return %c0_i32, %c0_i32_0 : i32, i32
  }
  func.func @transform_5(%arg0: i32) -> (i32, i32) {
    %c0_i32 = arith.constant 0 : i32
    %c0_i32_0 = arith.constant 0 : i32
    return %c0_i32, %arg0 : i32, i32
  }
}

</mosaic_0001>

<bundles_post_ra>
// kernel: one_hidden_forward.1
= control target key start
LH: loop header
LB: loop body
LE: loop exit
PB: predicated region body
PF: predicated region fallthrough
CT: control target
= control target key end

     0   :  { %vm438_vm0 = vcmask 261120   ;;  %s1051_s1 = inlined_call_operand.vmem [shape: f32[512,32], index: 1, kind: input, shape index: {}]   ;;  %s1052_s0 = inlined_call_operand.vmem [shape: f32[128,512], index: 0, kind: input, shape index: {}]   ;;  %s1053_s2 = inlined_call_operand.vmem [shape: f32[1,32], index: 2, kind: input, shape index: {}]   ;;  %s1054_s4 = inlined_call_operand.<no memory space> [shape: f32[1,1], index: 4, kind: input, shape index: {}]   ;;  %s1055_s3 = inlined_call_operand.vmem [shape: f32[1,32], index: 3, kind: input, shape index: {}]   ;;  %s1056_s5 = inlined_call_operand.vmem [shape: f32[1,128], index: 5, kind: output, shape index: {}]  }
   0x1   :  { %v133_v0 = vld [vmem:[%s1051_s1 + $0x178] sm:$0xff]  ;;  %v132_v2 = vld [vmem:[%s1051_s1 + $0x170] sm:$0xff]  ;;  %v131_v6 = vld [vmem:[%s1051_s1 + $0x168] sm:$0xff] }
   0x2   :  { %v101_v1 = vld [vmem:[%s1051_s1 + $0x78] sm:$0xff]  ;;  %284 = vmatpush.msra.mxu2 %v133_v0  ;;  %v100_v4 = vld [vmem:[%s1051_s1 + $0x70] sm:$0xff]  ;;  %v99_v8 = vld [vmem:[%s1051_s1 + $0x68] sm:$0xff] }
   0x3   :  { %154 = vmatpush.msra.mxu0 %v101_v1  ;;  %v149_v3 = vld [vmem:[%s1051_s1 + $0x1f8] sm:$0xff]  ;;  %v148_v7 = vld [vmem:[%s1051_s1 + $0x1f0] sm:$0xff]  ;;  %v147_v10 = vld [vmem:[%s1051_s1 + $0x1e8] sm:$0xff] }
   0x4   :  { %v117_v5 = vld [vmem:[%s1051_s1 + $0xf8] sm:$0xff]  ;;  %349 = vmatpush.msra.mxu3 %v149_v3  ;;  %285 = vmatpush.msra.mxu2 %v132_v2  ;;  %v116_v9 = vld [vmem:[%s1051_s1 + $0xf0] sm:$0xff]  ;;  %v130_v11 = vld [vmem:[%s1051_s1 + $0x160] sm:$0xff] }
   0x5   :  { %219 = vmatpush.msra.mxu1 %v117_v5  ;;  %155 = vmatpush.msra.mxu0 %v100_v4  ;;  %v98_v12 = vld [vmem:[%s1051_s1 + $0x60] sm:$0xff]  ;;  %v115_v13 = vld [vmem:[%s1051_s1 + $0xe8] sm:$0xff]  ;;  %v129_v16 = vld [vmem:[%s1051_s1 + $0x158] sm:$0xff] }
   0x6   :  { %350 = vmatpush.msra.mxu3 %v148_v7  ;;  %286 = vmatpush.msra.mxu2 %v131_v6  ;;  %v146_v14 = vld [vmem:[%s1051_s1 + $0x1e0] sm:$0xff]  ;;  %v97_v17 = vld [vmem:[%s1051_s1 + $0x58] sm:$0xff]  ;;  %v128_v20 = vld [vmem:[%s1051_s1 + $0x150] sm:$0xff] }
   0x7   :  { %220 = vmatpush.msra.mxu1 %v116_v9  ;;  %156 = vmatpush.msra.mxu0 %v99_v8  ;;  %v114_v15 = vld [vmem:[%s1051_s1 + $0xe0] sm:$0xff]  ;;  %v145_v18 = vld [vmem:[%s1051_s1 + $0x1d8] sm:$0xff]  ;;  %v96_v21 = vld [vmem:[%s1051_s1 + $0x50] sm:$0xff] }
   0x8   :  { %351 = vmatpush.msra.mxu3 %v147_v10  ;;  %287 = vmatpush.msra.mxu2 %v130_v11  ;;  %v113_v19 = vld [vmem:[%s1051_s1 + $0xd8] sm:$0xff]  ;;  %v144_v22 = vld [vmem:[%s1051_s1 + $0x1d0] sm:$0xff]  ;;  %v127_v24 = vld [vmem:[%s1051_s1 + $0x148] sm:$0xff] }
   0x9   :  { %221 = vmatpush.msra.mxu1 %v115_v13  ;;  %157 = vmatpush.msra.mxu0 %v98_v12  ;;  %v112_v23 = vld [vmem:[%s1051_s1 + $0xd0] sm:$0xff]  ;;  %v95_v25 = vld [vmem:[%s1051_s1 + $0x48] sm:$0xff]  ;;  %v126_v28 = vld [vmem:[%s1051_s1 + $0x140] sm:$0xff] }
   0xa   :  { %352 = vmatpush.msra.mxu3 %v146_v14  ;;  %288 = vmatpush.msra.mxu2 %v129_v16  ;;  %v143_v26 = vld [vmem:[%s1051_s1 + $0x1c8] sm:$0xff]  ;;  %v94_v29 = vld [vmem:[%s1051_s1 + $0x40] sm:$0xff]  ;;  %v125_v32 = vld [vmem:[%s1051_s1 + $0x138] sm:$0xff] }
   0xb   :  { %222 = vmatpush.msra.mxu1 %v114_v15  ;;  %158 = vmatpush.msra.mxu0 %v97_v17  ;;  %v111_v27 = vld [vmem:[%s1051_s1 + $0xc8] sm:$0xff]  ;;  %v142_v30 = vld [vmem:[%s1051_s1 + $0x1c0] sm:$0xff]  ;;  %v93_v33 = vld [vmem:[%s1051_s1 + $0x38] sm:$0xff] }
   0xc   :  { %353 = vmatpush.msra.mxu3 %v145_v18  ;;  %289 = vmatpush.msra.mxu2 %v128_v20  ;;  %v110_v31 = vld [vmem:[%s1051_s1 + $0xc0] sm:$0xff]  ;;  %v141_v34 = vld [vmem:[%s1051_s1 + $0x1b8] sm:$0xff]  ;;  %v124_v36 = vld [vmem:[%s1051_s1 + $0x130] sm:$0xff] }
   0xd   :  { %223 = vmatpush.msra.mxu1 %v113_v19  ;;  %159 = vmatpush.msra.mxu0 %v96_v21  ;;  %v109_v35 = vld [vmem:[%s1051_s1 + $0xb8] sm:$0xff]  ;;  %v92_v37 = vld [vmem:[%s1051_s1 + $0x30] sm:$0xff]  ;;  %v123_v40 = vld [vmem:[%s1051_s1 + $0x128] sm:$0xff] }
   0xe   :  { %354 = vmatpush.msra.mxu3 %v144_v22  ;;  %290 = vmatpush.msra.mxu2 %v127_v24  ;;  %v140_v38 = vld [vmem:[%s1051_s1 + $0x1b0] sm:$0xff]  ;;  %v91_v41 = vld [vmem:[%s1051_s1 + $0x28] sm:$0xff]  ;;  %v122_v44 = vld [vmem:[%s1051_s1 + $0x120] sm:$0xff] }
   0xf   :  { %224 = vmatpush.msra.mxu1 %v112_v23  ;;  %160 = vmatpush.msra.mxu0 %v95_v25  ;;  %v108_v39 = vld [vmem:[%s1051_s1 + $0xb0] sm:$0xff]  ;;  %v139_v42 = vld [vmem:[%s1051_s1 + $0x1a8] sm:$0xff]  ;;  %v90_v45 = vld [vmem:[%s1051_s1 + $0x20] sm:$0xff] }
  0x10   :  { %355 = vmatpush.msra.mxu3 %v143_v26  ;;  %291 = vmatpush.msra.mxu2 %v126_v28  ;;  %v107_v43 = vld [vmem:[%s1051_s1 + $0xa8] sm:$0xff]  ;;  %v138_v46 = vld [vmem:[%s1051_s1 + $0x1a0] sm:$0xff]  ;;  %v121_v48 = vld [vmem:[%s1051_s1 + $0x118] sm:$0xff] }
  0x11   :  { %225 = vmatpush.msra.mxu1 %v111_v27  ;;  %161 = vmatpush.msra.mxu0 %v94_v29  ;;  %v106_v47 = vld [vmem:[%s1051_s1 + $0xa0] sm:$0xff]  ;;  %v89_v49 = vld [vmem:[%s1051_s1 + $0x18] sm:$0xff]  ;;  %v120_v52 = vld [vmem:[%s1051_s1 + $0x110] sm:$0xff] }
  0x12   :  { %356 = vmatpush.msra.mxu3 %v142_v30  ;;  %292 = vmatpush.msra.mxu2 %v125_v32  ;;  %v137_v50 = vld [vmem:[%s1051_s1 + $0x198] sm:$0xff]  ;;  %v88_v53 = vld [vmem:[%s1051_s1 + $0x10] sm:$0xff]  ;;  %v119_v56 = vld [vmem:[%s1051_s1 + $0x108] sm:$0xff] }
  0x13   :  { %226 = vmatpush.msra.mxu1 %v110_v31  ;;  %162 = vmatpush.msra.mxu0 %v93_v33  ;;  %v105_v51 = vld [vmem:[%s1051_s1 + $0x98] sm:$0xff]  ;;  %v136_v54 = vld [vmem:[%s1051_s1 + $0x190] sm:$0xff]  ;;  %v87_v57 = vld [vmem:[%s1051_s1 + $0x8] sm:$0xff] }
  0x14   :  { %357 = vmatpush.msra.mxu3 %v141_v34  ;;  %293 = vmatpush.msra.mxu2 %v124_v36  ;;  %v104_v55 = vld [vmem:[%s1051_s1 + $0x90] sm:$0xff]  ;;  %v135_v58 = vld [vmem:[%s1051_s1 + $0x188] sm:$0xff]  ;;  %v118_v60 = vld [vmem:[%s1051_s1 + $0x100] sm:$0xff] }
  0x15   :  { %227 = vmatpush.msra.mxu1 %v109_v35  ;;  %163 = vmatpush.msra.mxu0 %v92_v37  ;;  %v103_v59 = vld [vmem:[%s1051_s1 + $0x88] sm:$0xff]  ;;  %v86_v61 = vld [vmem:[%s1051_s1] sm:$0xff]  ;;  %v24_v62 = vld [vmem:[%s1052_s0 + $0x10] sm:$0xff] }
  0x16   :  { %358 = vmatpush.msra.mxu3 %v140_v38  ;;  %294 = vmatpush.msra.mxu2 %v123_v40  ;;  %v134_v63 = vld [vmem:[%s1051_s1 + $0x180] sm:$0xff]  ;;  %v25_v1 = vld [vmem:[%s1052_s0 + $0x18] sm:$0xff]  ;;  %v23_v3 = vld [vmem:[%s1052_s0 + $0x8] sm:$0xff] }
  0x17   :  { %228 = vmatpush.msra.mxu1 %v108_v39  ;;  %164 = vmatpush.msra.mxu0 %v91_v41  ;;  %v22_v0 = vld [vmem:[%s1052_s0] sm:$0xff]  ;;  %v28_v4 = vld [vmem:[%s1052_s0 + $0x30] sm:$0xff]  ;;  %v29_v6 = vld [vmem:[%s1052_s0 + $0x38] sm:$0xff] }
  0x18   :  { %359 = vmatpush.msra.mxu3 %v139_v42  ;;  %295 = vmatpush.msra.mxu2 %v122_v44  ;;  %v102_v2 = vld [vmem:[%s1051_s1 + $0x80] sm:$0xff]  ;;  %v27_v7 = vld [vmem:[%s1052_s0 + $0x28] sm:$0xff]  ;;  %v32_v8 = vld [vmem:[%s1052_s0 + $0x50] sm:$0xff] }
  0x19   :  { %229 = vmatpush.msra.mxu1 %v107_v43  ;;  %165 = vmatpush.msra.mxu0 %v90_v45  ;;  %v26_v5 = vld [vmem:[%s1052_s0 + $0x20] sm:$0xff]  ;;  %v33_v10 = vld [vmem:[%s1052_s0 + $0x58] sm:$0xff]  ;;  %v31_v11 = vld [vmem:[%s1052_s0 + $0x48] sm:$0xff] }
  0x1a   :  { %360 = vmatpush.msra.mxu3 %v138_v46  ;;  %296 = vmatpush.msra.mxu2 %v121_v48  ;;  %v30_v9 = vld [vmem:[%s1052_s0 + $0x40] sm:$0xff]  ;;  %v36_v12 = vld [vmem:[%s1052_s0 + $0x70] sm:$0xff]  ;;  %v37_v14 = vld [vmem:[%s1052_s0 + $0x78] sm:$0xff] }
  0x1b   :  { %230 = vmatpush.msra.mxu1 %v106_v47  ;;  %166 = vmatpush.msra.mxu0 %v89_v49  ;;  %v34_v13 = vld [vmem:[%s1052_s0 + $0x60] sm:$0xff]  ;;  %v35_v15 = vld [vmem:[%s1052_s0 + $0x68] sm:$0xff]  ;;  %v40_v16 = vld [vmem:[%s1052_s0 + $0x90] sm:$0xff] }
  0x1c   :  { %361 = vmatpush.msra.mxu3 %v137_v50  ;;  %297 = vmatpush.msra.mxu2 %v120_v52  ;;  %v38_v17 = vld [vmem:[%s1052_s0 + $0x80] sm:$0xff]  ;;  %v41_v18 = vld [vmem:[%s1052_s0 + $0x98] sm:$0xff]  ;;  %v39_v19 = vld [vmem:[%s1052_s0 + $0x88] sm:$0xff] }
  0x1d   :  { %231 = vmatpush.msra.mxu1 %v105_v51  ;;  %167 = vmatpush.msra.mxu0 %v88_v53  ;;  %v44_v20 = vld [vmem:[%s1052_s0 + $0xb0] sm:$0xff]  ;;  %v42_v21 = vld [vmem:[%s1052_s0 + $0xa0] sm:$0xff]  ;;  %v45_v22 = vld [vmem:[%s1052_s0 + $0xb8] sm:$0xff] }
  0x1e   :  { %362 = vmatpush.msra.mxu3 %v136_v54  ;;  %298 = vmatpush.msra.mxu2 %v119_v56  ;;  %v43_v23 = vld [vmem:[%s1052_s0 + $0xa8] sm:$0xff]  ;;  %v48_v24 = vld [vmem:[%s1052_s0 + $0xd0] sm:$0xff]  ;;  %v46_v25 = vld [vmem:[%s1052_s0 + $0xc0] sm:$0xff] }
  0x1f   :  { %232 = vmatpush.msra.mxu1 %v104_v55  ;;  %168 = vmatpush.msra.mxu0 %v87_v57  ;;  %v49_v26 = vld [vmem:[%s1052_s0 + $0xd8] sm:$0xff]  ;;  %v47_v27 = vld [vmem:[%s1052_s0 + $0xc8] sm:$0xff]  ;;  %v52_v28 = vld [vmem:[%s1052_s0 + $0xf0] sm:$0xff] }
  0x20   :  { %363 = vmatpush.msra.mxu3 %v135_v58  ;;  %299 = vmatpush.msra.mxu2 %v118_v60  ;;  %v50_v29 = vld [vmem:[%s1052_s0 + $0xe0] sm:$0xff]  ;;  %v53_v30 = vld [vmem:[%s1052_s0 + $0xf8] sm:$0xff]  ;;  %v51_v31 = vld [vmem:[%s1052_s0 + $0xe8] sm:$0xff] }
  0x21   :  { %233 = vmatpush.msra.mxu1 %v103_v59  ;;  %169 = vmatpush.msra.mxu0 %v86_v61  ;;  %v56_v32 = vld [vmem:[%s1052_s0 + $0x110] sm:$0xff]  ;;  %v54_v33 = vld [vmem:[%s1052_s0 + $0x100] sm:$0xff]  ;;  %v57_v34 = vld [vmem:[%s1052_s0 + $0x118] sm:$0xff] }
  0x22   :  { %300 = vmatmul.f32.vlgmr.msra.gmra.mxu2 %v24_v62  ;;  %364 = vmatpush.msra.mxu3 %v134_v63  ;;  %v55_v35 = vld [vmem:[%s1052_s0 + $0x108] sm:$0xff]  ;;  %v60_v36 = vld [vmem:[%s1052_s0 + $0x130] sm:$0xff]  ;;  %v58_v37 = vld [vmem:[%s1052_s0 + $0x120] sm:$0xff] }
  0x23   :  { %170 = vmatmul.f32.vlgmr.msra.gmra.mxu0 %v22_v0  ;;  %365 = vmatmul.f32.vlgmr.msra.gmra.mxu3 %v25_v1  ;;  %v61_v38 = vld [vmem:[%s1052_s0 + $0x138] sm:$0xff]  ;;  %v59_v39 = vld [vmem:[%s1052_s0 + $0x128] sm:$0xff]  ;;  %v64_v40 = vld [vmem:[%s1052_s0 + $0x150] sm:$0xff] }
  0x24   :  { %234 = vmatpush.msra.mxu1 %v102_v2  ;;  %v62_v41 = vld [vmem:[%s1052_s0 + $0x140] sm:$0xff]  ;;  %v65_v42 = vld [vmem:[%s1052_s0 + $0x158] sm:$0xff]  ;;  %v63_v43 = vld [vmem:[%s1052_s0 + $0x148] sm:$0xff] }
  0x25   :  { %235 = vmatmul.f32.vlgmr.msra.gmra.mxu1 %v23_v3  ;;  %v68_v44 = vld [vmem:[%s1052_s0 + $0x170] sm:$0xff]  ;;  %v66_v45 = vld [vmem:[%s1052_s0 + $0x160] sm:$0xff]  ;;  %v69_v46 = vld [vmem:[%s1052_s0 + $0x178] sm:$0xff] }
  0x26   :  { %v67_v47 = vld [vmem:[%s1052_s0 + $0x168] sm:$0xff]  ;;  %v72_v48 = vld [vmem:[%s1052_s0 + $0x190] sm:$0xff]  ;;  %v70_v49 = vld [vmem:[%s1052_s0 + $0x180] sm:$0xff] }
  0x27   :  { %v73_v50 = vld [vmem:[%s1052_s0 + $0x198] sm:$0xff]  ;;  %v71_v51 = vld [vmem:[%s1052_s0 + $0x188] sm:$0xff]  ;;  %v76_v52 = vld [vmem:[%s1052_s0 + $0x1b0] sm:$0xff] }
  0x28   :  { %v74_v53 = vld [vmem:[%s1052_s0 + $0x1a0] sm:$0xff]  ;;  %v77_v54 = vld [vmem:[%s1052_s0 + $0x1b8] sm:$0xff]  ;;  %v75_v55 = vld [vmem:[%s1052_s0 + $0x1a8] sm:$0xff] }
  0x29   :  { %v80_v56 = vld [vmem:[%s1052_s0 + $0x1d0] sm:$0xff]  ;;  %v78_v57 = vld [vmem:[%s1052_s0 + $0x1c0] sm:$0xff]  ;;  %v81_v58 = vld [vmem:[%s1052_s0 + $0x1d8] sm:$0xff] }
  0x2a   :  { %303 = vmatmul.f32.gmra.mxu2 %v28_v4  ;;  %v79_v59 = vld [vmem:[%s1052_s0 + $0x1c8] sm:$0xff]  ;;  %v84_v60 = vld [vmem:[%s1052_s0 + $0x1f0] sm:$0xff]  ;;  %v82_v61 = vld [vmem:[%s1052_s0 + $0x1e0] sm:$0xff] }
  0x2b   :  { %173 = vmatmul.f32.gmra.mxu0 %v26_v5  ;;  %368 = vmatmul.f32.gmra.mxu3 %v29_v6  ;;  %v85_v62 = vld [vmem:[%s1052_s0 + $0x1f8] sm:$0xff]  ;;  %v83_v63 = vld [vmem:[%s1052_s0 + $0x1e8] sm:$0xff]  ;;  %v977_v0 = vld [vmem:[%s1053_s2] ss:$0 sm:$0xff] }
  0x2d   :  { %238 = vmatmul.f32.gmra.mxu1 %v27_v7 }
  0x32   :  { %306 = vmatmul.f32.gmra.mxu2 %v32_v8 }
  0x33   :  { %176 = vmatmul.f32.gmra.mxu0 %v30_v9  ;;  %371 = vmatmul.f32.gmra.mxu3 %v33_v10 }
  0x35   :  { %241 = vmatmul.f32.gmra.mxu1 %v31_v11 }
  0x3a   :  { %309 = vmatmul.f32.gmra.mxu2 %v36_v12 }
  0x3b   :  { %179 = vmatmul.f32.gmra.mxu0 %v34_v13  ;;  %374 = vmatmul.f32.gmra.mxu3 %v37_v14 }
  0x3d   :  { %244 = vmatmul.f32.gmra.mxu1 %v35_v15 }
  0x42   :  { %312 = vmatmul.f32.gmra.mxu2 %v40_v16 }
  0x43   :  { %182 = vmatmul.f32.gmra.mxu0 %v38_v17  ;;  %377 = vmatmul.f32.gmra.mxu3 %v41_v18 }
  0x45   :  { %247 = vmatmul.f32.gmra.mxu1 %v39_v19 }
  0x4a   :  { %315 = vmatmul.f32.gmra.mxu2 %v44_v20 }
  0x4b   :  { %185 = vmatmul.f32.gmra.mxu0 %v42_v21  ;;  %380 = vmatmul.f32.gmra.mxu3 %v45_v22 }
  0x4d   :  { %250 = vmatmul.f32.gmra.mxu1 %v43_v23 }
  0x52   :  { %318 = vmatmul.f32.gmra.mxu2 %v48_v24 }
  0x53   :  { %188 = vmatmul.f32.gmra.mxu0 %v46_v25  ;;  %383 = vmatmul.f32.gmra.mxu3 %v49_v26 }
  0x55   :  { %253 = vmatmul.f32.gmra.mxu1 %v47_v27 }
  0x5a   :  { %321 = vmatmul.f32.gmra.mxu2 %v52_v28 }
  0x5b   :  { %191 = vmatmul.f32.gmra.mxu0 %v50_v29  ;;  %386 = vmatmul.f32.gmra.mxu3 %v53_v30 }
  0x5d   :  { %256 = vmatmul.f32.gmra.mxu1 %v51_v31 }
  0x62   :  { %324 = vmatmul.f32.gmra.mxu2 %v56_v32 }
  0x63   :  { %194 = vmatmul.f32.gmra.mxu0 %v54_v33  ;;  %389 = vmatmul.f32.gmra.mxu3 %v57_v34 }
  0x65   :  { %259 = vmatmul.f32.gmra.mxu1 %v55_v35 }
  0x6a   :  { %327 = vmatmul.f32.gmra.mxu2 %v60_v36 }
  0x6b   :  { %197 = vmatmul.f32.gmra.mxu0 %v58_v37  ;;  %392 = vmatmul.f32.gmra.mxu3 %v61_v38 }
  0x6d   :  { %262 = vmatmul.f32.gmra.mxu1 %v59_v39 }
  0x72   :  { %330 = vmatmul.f32.gmra.mxu2 %v64_v40 }
  0x73   :  { %200 = vmatmul.f32.gmra.mxu0 %v62_v41  ;;  %395 = vmatmul.f32.gmra.mxu3 %v65_v42 }
  0x75   :  { %265 = vmatmul.f32.gmra.mxu1 %v63_v43 }
  0x7a   :  { %333 = vmatmul.f32.gmra.mxu2 %v68_v44 }
  0x7b   :  { %203 = vmatmul.f32.gmra.mxu0 %v66_v45  ;;  %398 = vmatmul.f32.gmra.mxu3 %v69_v46 }
  0x7d   :  { %268 = vmatmul.f32.gmra.mxu1 %v67_v47 }
  0x82   :  { %336 = vmatmul.f32.gmra.mxu2 %v72_v48 }
  0x83   :  { %206 = vmatmul.f32.gmra.mxu0 %v70_v49  ;;  %401 = vmatmul.f32.gmra.mxu3 %v73_v50 }
  0x85   :  { %271 = vmatmul.f32.gmra.mxu1 %v71_v51 }
  0x8a   :  { %339 = vmatmul.f32.gmra.mxu2 %v76_v52 }
  0x8b   :  { %209 = vmatmul.f32.gmra.mxu0 %v74_v53  ;;  %404 = vmatmul.f32.gmra.mxu3 %v77_v54 }
  0x8d   :  { %274 = vmatmul.f32.gmra.mxu1 %v75_v55 }
  0x92   :  { %342 = vmatmul.f32.gmra.mxu2 %v80_v56 }
  0x93   :  { %212 = vmatmul.f32.gmra.mxu0 %v78_v57  ;;  %407 = vmatmul.f32.gmra.mxu3 %v81_v58 }
  0x95   :  { %277 = vmatmul.f32.gmra.mxu1 %v79_v59 }
  0x9a   :  { %345 = vmatmul.f32.gmra.mxu2 %v84_v60 }
  0x9b   :  { %215 = vmatmul.f32.gmra.mxu0 %v82_v61  ;;  %410 = vmatmul.f32.gmra.mxu3 %v85_v62 }
  0x9d   :  { %280 = vmatmul.f32.gmra.mxu1 %v83_v63 }
  0xa0   :  { %v171_v1 = vpop.f32.mrf.mxu0 }
  0xa1   :  { %v172_v2 = vadd.f32 %v977_v0, %v171_v1 }
  0xa2   :  { %v236_v3 = vpop.f32.mrf.mxu1 }
  0xa3   :  { %v237_v4 = vadd.f32 %v236_v3, %v172_v2 }
  0xa5   :  { %v301_v5 = vpop.f32.mrf.mxu2 }
  0xa6   :  { %v302_v6 = vadd.f32 %v301_v5, %v237_v4  ;;  %v366_v7 = vpop.f32.mrf.mxu3 }
  0xa8   :  { %v980_v8 = vadd.f32 %v366_v7, %v302_v6  ;;  %v174_v9 = vpop.f32.mrf.mxu0 }
  0xa9   :  { %v175_v10 = vadd.f32 %v977_v0, %v174_v9 }
  0xaa   :  { %v239_v11 = vpop.f32.mrf.mxu1 }
  0xab   :  { %v240_v12 = vadd.f32 %v239_v11, %v175_v10 }
  0xad   :  { %v304_v13 = vpop.f32.mrf.mxu2 }
  0xae   :  { %v305_v14 = vadd.f32 %v304_v13, %v240_v12  ;;  %v369_v15 = vpop.f32.mrf.mxu3 }
  0xb0   :  { %v983_v16 = vadd.f32 %v369_v15, %v305_v14  ;;  %v177_v17 = vpop.f32.mrf.mxu0 }
  0xb1   :  { %v178_v18 = vadd.f32 %v977_v0, %v177_v17 }
  0xb2   :  { %v242_v19 = vpop.f32.mrf.mxu1 }
  0xb3   :  { %v243_v20 = vadd.f32 %v242_v19, %v178_v18 }
  0xb5   :  { %v307_v21 = vpop.f32.mrf.mxu2 }
  0xb6   :  { %v308_v22 = vadd.f32 %v307_v21, %v243_v20  ;;  %v372_v23 = vpop.f32.mrf.mxu3 }
  0xb8   :  { %v986_v24 = vadd.f32 %v372_v23, %v308_v22  ;;  %v180_v25 = vpop.f32.mrf.mxu0 }
  0xb9   :  { %v181_v26 = vadd.f32 %v977_v0, %v180_v25 }
  0xba   :  { %v245_v27 = vpop.f32.mrf.mxu1 }
  0xbb   :  { %v246_v28 = vadd.f32 %v245_v27, %v181_v26 }
  0xbd   :  { %v310_v29 = vpop.f32.mrf.mxu2 }
  0xbe   :  { %v311_v30 = vadd.f32 %v310_v29, %v246_v28  ;;  %v375_v31 = vpop.f32.mrf.mxu3 }
  0xc0   :  { %v989_v32 = vadd.f32 %v375_v31, %v311_v30  ;;  %v183_v33 = vpop.f32.mrf.mxu0 }
  0xc1   :  { %v184_v34 = vadd.f32 %v977_v0, %v183_v33 }
  0xc2   :  { %v248_v35 = vpop.f32.mrf.mxu1 }
  0xc3   :  { %v249_v36 = vadd.f32 %v248_v35, %v184_v34 }
  0xc5   :  { %v313_v37 = vpop.f32.mrf.mxu2 }
  0xc6   :  { %v314_v38 = vadd.f32 %v313_v37, %v249_v36  ;;  %v378_v39 = vpop.f32.mrf.mxu3 }
  0xc8   :  { %v992_v40 = vadd.f32 %v378_v39, %v314_v38  ;;  %v186_v41 = vpop.f32.mrf.mxu0 }
  0xc9   :  { %v187_v42 = vadd.f32 %v977_v0, %v186_v41 }
  0xca   :  { %v251_v43 = vpop.f32.mrf.mxu1 }
  0xcb   :  { %v252_v44 = vadd.f32 %v251_v43, %v187_v42 }
  0xcd   :  { %v316_v45 = vpop.f32.mrf.mxu2 }
  0xce   :  { %v317_v46 = vadd.f32 %v316_v45, %v252_v44  ;;  %v381_v47 = vpop.f32.mrf.mxu3 }
  0xd0   :  { %v995_v48 = vadd.f32 %v381_v47, %v317_v46  ;;  %v189_v49 = vpop.f32.mrf.mxu0 }
  0xd1   :  { %v190_v50 = vadd.f32 %v977_v0, %v189_v49 }
  0xd2   :  { %v254_v51 = vpop.f32.mrf.mxu1 }
  0xd3   :  { %v255_v52 = vadd.f32 %v254_v51, %v190_v50 }
  0xd5   :  { %v319_v53 = vpop.f32.mrf.mxu2 }
  0xd6   :  { %v320_v54 = vadd.f32 %v319_v53, %v255_v52  ;;  %v384_v55 = vpop.f32.mrf.mxu3 }
  0xd8   :  { %v998_v56 = vadd.f32 %v384_v55, %v320_v54  ;;  %v192_v57 = vpop.f32.mrf.mxu0 }
  0xd9   :  { %v193_v58 = vadd.f32 %v977_v0, %v192_v57 }
  0xda   :  { %v257_v59 = vpop.f32.mrf.mxu1 }
  0xdb   :  { %v258_v60 = vadd.f32 %v257_v59, %v193_v58 }
  0xdd   :  { %v322_v61 = vpop.f32.mrf.mxu2 }
  0xde   :  { %v323_v62 = vadd.f32 %v322_v61, %v258_v60  ;;  %v387_v63 = vpop.f32.mrf.mxu3 }
  0xe0   :  { %v1001_v1 = vadd.f32 %v387_v63, %v323_v62  ;;  %v195_v2 = vpop.f32.mrf.mxu0 }
  0xe1   :  { %v196_v3 = vadd.f32 %v977_v0, %v195_v2 }
  0xe2   :  { %v260_v4 = vpop.f32.mrf.mxu1 }
  0xe3   :  { %v261_v5 = vadd.f32 %v260_v4, %v196_v3 }
  0xe5   :  { %v325_v6 = vpop.f32.mrf.mxu2 }
  0xe6   :  { %v326_v7 = vadd.f32 %v325_v6, %v261_v5  ;;  %v390_v9 = vpop.f32.mrf.mxu3 }
  0xe8   :  { %v1004_v10 = vadd.f32 %v390_v9, %v326_v7  ;;  %v198_v11 = vpop.f32.mrf.mxu0 }
  0xe9   :  { %v199_v12 = vadd.f32 %v977_v0, %v198_v11 }
  0xea   :  { %v263_v13 = vpop.f32.mrf.mxu1 }
  0xeb   :  { %v264_v14 = vadd.f32 %v263_v13, %v199_v12 }
  0xed   :  { %v328_v15 = vpop.f32.mrf.mxu2 }
  0xee   :  { %v329_v17 = vadd.f32 %v328_v15, %v264_v14  ;;  %v393_v18 = vpop.f32.mrf.mxu3 }
  0xf0   :  { %v1007_v19 = vadd.f32 %v393_v18, %v329_v17  ;;  %v201_v20 = vpop.f32.mrf.mxu0 }
  0xf1   :  { %v202_v2 = vadd.f32 %v977_v0, %v201_v20 }
  0xf2   :  { %v266_v21 = vpop.f32.mrf.mxu1  ;;  %v423_v20 = vmax.f32 %v1007_v19, 0.0  ;;  %v419_v19 = vmax.f32 %v995_v48, 0.0  ;;  %v414_v48 = vmax.f32 %v980_v8, 0.0 }
  0xf3   :  { %v267_v7 = vadd.f32 %v266_v21, %v202_v2  ;;  %v422_v21 = vmax.f32 %v1004_v10, 0.0 }
  0xf5   :  { %v331_v22 = vpop.f32.mrf.mxu2 }
  0xf6   :  { %v396_v23 = vpop.f32.mrf.mxu3  ;;  %v332_v13 = vadd.f32 %v331_v22, %v267_v7  ;;  %v421_v22 = vmax.f32 %v1001_v1, 0.0  ;;  %v418_v1 = vmax.f32 %v992_v40, 0.0  ;;  %v430_v40 = vld [vmem:[%s1055_s3] sm:$0x1] }
  0xf8   :  { %v204_v25 = vpop.f32.mrf.mxu0  ;;  %v397_v17 = vadd.f32 %v396_v23, %v332_v13  ;;  %v10_v23 = vstv %s1054_s4 }
  0xf9   :  { %v205_v59 = vadd.f32 %v977_v0, %v204_v25  ;;  %v559_v25 = vmov 0   ;;  %11 = vst [vmem:[#allocation2] sm:$0x1] %v10_v23 }
  0xfa   :  { %v269_v26 = vpop.f32.mrf.mxu1  ;;  %553 = vset.pattern.permute.xlu0 %v559_v25 }
  0xfb   :  { %v270_v3 = vadd.f32 %v269_v26, %v205_v59  ;;  %v420_v26 = vmax.f32 %v998_v56, 0.0  ;;  %v415_v56 = vmax.f32 %v983_v16, 0.0 }
  0xfd   :  { %v334_v27 = vpop.f32.mrf.mxu2 }
  0xfe   :  { %v399_v28 = vpop.f32.mrf.mxu3  ;;  %v335_v9 = vadd.f32 %v334_v27, %v270_v3  ;;  %v417_v27 = vmax.f32 %v989_v32, 0.0 }
 0x100   :  { %v207_v29 = vpop.f32.mrf.mxu0  ;;  %v400_v14 = vadd.f32 %v399_v28, %v335_v9  ;;  %v431_v10 = vld [vmem:[#allocation2] sm:$0x1]  ;;  %v416_v28 = vmax.f32 %v986_v24, 0.0 }
 0x101   :  { %v208_v52 = vadd.f32 %v977_v0, %v207_v29  ;;  %434 = vperm.xlu0 %553, %v431_v10  }
 0x102   :  { %v272_v30 = vpop.f32.mrf.mxu1  ;;  %v425_v18 = vmax.f32 %v400_v14, 0.0 }
 0x103   :  { %v273_v60 = vadd.f32 %v272_v30, %v208_v52 }
 0x105   :  { %v337_v31 = vpop.f32.mrf.mxu2 }
 0x106   :  { %v402_v33 = vpop.f32.mrf.mxu3  ;;  %v338_v4 = vadd.f32 %v337_v31, %v273_v60 }
 0x108   :  { %v210_v34 = vpop.f32.mrf.mxu0  ;;  %v403_v11 = vadd.f32 %v402_v33, %v338_v4 }
 0x109   :  { %v211_v46 = vadd.f32 %v977_v0, %v210_v34 }
 0x10a   :  { %v275_v35 = vpop.f32.mrf.mxu1  ;;  %v426_v15 = vmax.f32 %v403_v11, 0.0 }
 0x10b   :  { %v276_v53 = vadd.f32 %v275_v35, %v211_v46 }
 0x10d   :  { %v340_v36 = vpop.f32.mrf.mxu2 }
 0x10e   :  { %v405_v37 = vpop.f32.mrf.mxu3  ;;  %v341_v61 = vadd.f32 %v340_v36, %v276_v53 }
 0x110   :  { %v213_v38 = vpop.f32.mrf.mxu0  ;;  %v406_v5 = vadd.f32 %v405_v37, %v341_v61 }
 0x111   :  { %v214_v42 = vadd.f32 %v977_v0, %v213_v38 }
 0x112   :  { %v278_v39 = vpop.f32.mrf.mxu1  ;;  %v427_v12 = vmax.f32 %v406_v5, 0.0 }
 0x113   :  { %v279_v47 = vadd.f32 %v278_v39, %v214_v42 }
 0x115   :  { %v343_v41 = vpop.f32.mrf.mxu2 }
 0x116   :  { %v408_v43 = vpop.f32.mrf.mxu3  ;;  %v344_v54 = vadd.f32 %v343_v41, %v279_v47 }
 0x118   :  { %v216_v44 = vpop.f32.mrf.mxu0  ;;  %v409_v62 = vadd.f32 %v408_v43, %v344_v54 }
 0x119   :  { %v217_v45 = vadd.f32 %v977_v0, %v216_v44  ;;  %v424_v0 = vmax.f32 %v397_v17, 0.0 }
 0x11a   :  { %v281_v49 = vpop.f32.mrf.mxu1  ;;  %v428_v6 = vmax.f32 %v409_v62, 0.0 }
 0x11b   :  { %v282_v50 = vadd.f32 %v281_v49, %v217_v45 }
 0x11d   :  { %v346_v51 = vpop.f32.mrf.mxu2 }
 0x11e   :  { %v347_v55 = vadd.f32 %v346_v51, %v282_v50  ;;  %v411_v57 = vpop.f32.mrf.mxu3 }
 0x120   :  { %v412_v58 = vadd.f32 %v411_v57, %v347_v55 }
 0x122   :  { %v429_v63 = vmax.f32 %v412_v58, 0.0 }
 0x124   :  { %534 = vmatpush.xpose.msk.msrb.mxu0 %vm438_vm0, %v429_v63 }
 0x128   :  { %535 = vmatpush.xpose.msk.msrb.mxu0 %vm438_vm0, %v428_v6 }
 0x12c   :  { %536 = vmatpush.xpose.msk.msrb.mxu0 %vm438_vm0, %v427_v12 }
 0x130   :  { %537 = vmatpush.xpose.msk.msrb.mxu0 %vm438_vm0, %v426_v15 }
 0x134   :  { %538 = vmatpush.xpose.msk.msrb.mxu0 %vm438_vm0, %v425_v18 }
 0x138   :  { %539 = vmatpush.xpose.msk.msrb.mxu0 %vm438_vm0, %v424_v0 }
 0x13c   :  { %540 = vmatpush.xpose.msk.msrb.mxu0 %vm438_vm0, %v423_v20 }
 0x140   :  { %541 = vmatpush.xpose.msk.msrb.mxu0 %vm438_vm0, %v422_v21 }
 0x144   :  { %542 = vmatpush.xpose.msk.msrb.mxu0 %vm438_vm0, %v421_v22 }
 0x148   :  { %543 = vmatpush.xpose.msk.msrb.mxu0 %vm438_vm0, %v420_v26 }
 0x14c   :  { %544 = vmatpush.xpose.msk.msrb.mxu0 %vm438_vm0, %v419_v19 }
 0x150   :  { %545 = vmatpush.xpose.msk.msrb.mxu0 %vm438_vm0, %v418_v1 }
 0x154   :  { %546 = vmatpush.xpose.msk.msrb.mxu0 %vm438_vm0, %v417_v27 }
 0x158   :  { %547 = vmatpush.xpose.msk.msrb.mxu0 %vm438_vm0, %v416_v28 }
 0x15c   :  { %548 = vmatpush.xpose.msk.msrb.mxu0 %vm438_vm0, %v415_v56 }
 0x160   :  { %549 = vmatpush.xpose.msk.msrb.mxu0 %vm438_vm0, %v414_v48 }
 0x163   :  { %550 = vmatmul.msk.f32.vlgmr.msrb.gmra.mxu0 %vm438_vm0, %v430_v40 }
 0x173   :  { %v435_v32 = vpop.permute.xlu0 %434 }
 0x174   :  { %v437_v29 = vperm.slane %v435_v32, 0 }
 0x1e0   :  { %v507_v30 = vpop.f32.mrf.mxu0 }
 0x1e1   :  { %v508_v24 = vadd.f32 %v507_v30, %v437_v29 }
 0x1e3   :  { %v551_v31 = vmul.f32 -1.442695, %v508_v24 }
 0x1e5   :  { %555 = vpow2.f32 %v551_v31 }
 0x1eb   :  { %v556_v33 = vpop.eup %555 }
 0x1ec   :  { %v513_v16 = vadd.f32 1.0, %v556_v33 }
 0x1ee   :  { %557 = vrcp.f32 %v513_v16  ;;  %v525_v36 = vand.u32 2147483648, %v513_v16  ;;  %v523_v38 = vand.u32 2147483647, %v513_v16  ;;  %vm519_vm2 = vweird.f32 %v513_v16 }
 0x1f0   :  { %v526_v41 = vor.u32 1.1754944e-38, %v525_v36  ;;  %vm524_vm4 = vcmp.eq.f32.partialorder %v523_v38, 8.507059e+37 }
 0x1f4   :  { %v558_v34 = vpop.eup %557 }
 0x1f5   :  { %v515_v35 = vmul.f32 %v558_v34, %v513_v16  ;;  %vm520_vm1 = vweird.f32 %v558_v34 }
 0x1f6   :  { %vm521_vm3 = vmor %vm519_vm2, %vm520_vm1 }
 0x1f7   :  { %v516_v8 = vsub.f32 1.0, %v515_v35 }
 0x1f9   :  { %v517_v37 = vmul.f32 %v558_v34, %v516_v8 }
 0x1fb   :  { %v518_v39 = vadd.f32 %v558_v34, %v517_v37 }
 0x1fd   :  { %v522_v42 = vsel %vm521_vm3, %v558_v34, %v518_v39 }
 0x1fe   :  { %v527_v43 = vsel %vm524_vm4, %v526_v41, %v522_v42 }
 0x1ff   :  { %529 = vst [vmem:[%s1056_s5] sm:$0x1] %v527_v43 }

</bundles_post_ra>
